<compile_context>
chip_gen: v7x
topology: tpu7x:2x2x1
jax: 0.10.0
libtpu: 0.0.40
codegen_flags: <defaults>
</compile_context>

<pallas_src>
import functools

import jax
import jax.numpy as jnp
from jax.experimental import pallas as pl
from jax.experimental.pallas import tpu as pltpu

_D = 768     # fc3 input width (ViT hidden size)
_H = 128     # fc3 output width
_LANE = 128  # lane-dense padded fc4 output width


def _head_kernel(cls_ref, w3_ref, b3_ref, w4_ref, b4_ref, out_ref):
    # fc3: (B_pad, 768)bf16 @ (768, 128)bf16 -> f32 accumulate.
    h = jnp.dot(cls_ref[...], w3_ref[...], preferred_element_type=jnp.float32)
    # Bias + ReLU kept in f32 (v5e VPU has no bf16 ALUs; rides free under MXU slack).
    h = jnp.maximum(h + b3_ref[...], 0.0)                        # (B_pad, 128) f32

    # fc4 in bf16 on a lane-dense zero-padded weight, + lane-dense padded b4.
    # Columns 2..127 of w4/b4 are zero; the wrapper slices out columns 0:2.
    out_ref[...] = (
        jnp.dot(h.astype(jnp.bfloat16), w4_ref[...],
                preferred_element_type=jnp.float32)
        + b4_ref[...]
    )


def make_head_params(w3, b3, w4, b4):
    """One-time weight preprocessing (hoist out of the per-call latency path)."""
    out_features = int(w4.shape[1])
    w3_bf16 = w3.astype(jnp.bfloat16)                                      # (768, 128)
    b3_f32 = jnp.reshape(b3, (1, _H)).astype(jnp.float32)                  # (1, 128)
    w4_pad = jnp.pad(w4, ((0, 0), (0, _LANE - out_features))).astype(jnp.bfloat16)  # (128,128)
    b4_pad = jnp.pad(jnp.reshape(b4, (1, out_features)),
                     ((0, 0), (0, _LANE - out_features))).astype(jnp.float32)       # (1,128)
    return w3_bf16, b3_f32, w4_pad, b4_pad, out_features


@functools.partial(jax.jit, static_argnames=("out_features",))
def regression_head(sequence_output, w3_bf16, b3_f32, w4_pad_bf16, b4_pad_f32,
                    *, out_features=2):
    """Pallas implementation of
        x = sequence_output[:, 0, :]
        x = relu(x @ w3 + b3)
        x = x @ w4 + b4
    with preprocessed (bf16 / lane-padded) head parameters.
    """
    B = sequence_output.shape[0]

    # CLS select + batch padding + bf16 cast all fuse under jit with the pallas_call.
    B_pad = ((B + 7) // 8) * 8
    cls = sequence_output[:, 0, :].astype(jnp.bfloat16)           # (B, 768) bf16
    cls = jnp.pad(cls, ((0, B_pad - B), (0, 0)))                  # (B_pad, 768)

    flops = 2 * B_pad * (_D * _H + _H * _LANE)
    bytes_accessed = (cls.size * 2 + w3_bf16.size * 2 + b3_f32.size * 4
                      + w4_pad_bf16.size * 2 + b4_pad_f32.size * 4
                      + B_pad * _LANE * 4)

    out = pl.pallas_call(
        _head_kernel,
        out_shape=jax.ShapeDtypeStruct((B_pad, _LANE), jnp.float32),
        in_specs=[
            pl.BlockSpec(memory_space=pltpu.MemorySpace.VMEM),  # cls    (B_pad, 768) bf16
            pl.BlockSpec(memory_space=pltpu.MemorySpace.VMEM),  # w3     (768, 128)   bf16
            pl.BlockSpec(memory_space=pltpu.MemorySpace.VMEM),  # b3     (1, 128)     f32
            pl.BlockSpec(memory_space=pltpu.MemorySpace.VMEM),  # w4_pad (128, 128)   bf16
            pl.BlockSpec(memory_space=pltpu.MemorySpace.VMEM),  # b4_pad (1, 128)     f32
        ],
        out_specs=pl.BlockSpec(memory_space=pltpu.MemorySpace.VMEM),
        cost_estimate=pl.CostEstimate(flops=flops, transcendentals=0,
                                      bytes_accessed=bytes_accessed),
    )(cls, w3_bf16, b3_f32, w4_pad_bf16, b4_pad_f32)

    # Slice away batch / lane padding (fused under jit; b4 already added in-kernel).
    return out[:B, :out_features]


def _reference(sequence_output, w3, b3, w4, b4):
    x = sequence_output[:, 0, :]
    x = jnp.maximum(x @ w3 + jnp.reshape(b3, (1, -1)), 0.0)
    return x @ w4 + jnp.reshape(b4, (1, -1))


if __name__ == "__main__":
    key = jax.random.PRNGKey(0)
    k_seq, k_w3, k_b3, k_w4, k_b4 = jax.random.split(key, 5)

    # Small shapes consistent with the module: batch=2, seq=8 tokens, hidden=768.
    # (768 and 128 are fixed by fc3/fc4; batch and token count are free.)
    B, S, D, H, OUT = 2, 8, 768, 128, 2

    # Synthetic stand-in for the Dinov2 backbone output (see TODO above).
    sequence_output = jax.random.normal(k_seq, (B, S, D), dtype=jnp.float32)

    # Deterministic head parameters (shapes from nn.Linear(768,128) / nn.Linear(128,2)).
    w3 = jax.random.normal(k_w3, (D, H), dtype=jnp.float32) * (1.0 / D**0.5)
    b3 = jax.random.normal(k_b3, (H,), dtype=jnp.float32) * 0.01
    w4 = jax.random.normal(k_w4, (H, OUT), dtype=jnp.float32) * (1.0 / H**0.5)
    b4 = jax.random.normal(k_b4, (OUT,), dtype=jnp.float32) * 0.01

    # One-time preprocessing (would live at model init / param load in production).
    w3_bf16, b3_f32, w4_pad, b4_pad, out_features = make_head_params(w3, b3, w4, b4)

    out = regression_head(sequence_output, w3_bf16, b3_f32, w4_pad, b4_pad,
                          out_features=out_features)
    out = jax.block_until_ready(out)

    ref = _reference(sequence_output, w3, b3, w4, b4)
    assert out.shape == (B, OUT), out.shape
    # Tolerance loosened vs the pure-f32 reference because cls/w3/h/w4 go through
    # bf16 (f32 MXU accumulation); error is O(1e-3) for these magnitudes.
    assert jnp.allclose(out, ref, atol=5e-2, rtol=5e-2), "mismatch vs reference"

    print("KERNEL_OK")
</pallas_src>

<mosaic_0001>
module attributes {stable_mosaic.version = 11 : i64} {
  func.func @_head_kernel(%arg0: memref<8x768xbf16, #tpu.memory_space<vmem>>, %arg1: memref<768x128xbf16, #tpu.memory_space<vmem>>, %arg2: memref<1x128xf32, #tpu.memory_space<vmem>>, %arg3: memref<128x128xbf16, #tpu.memory_space<vmem>>, %arg4: memref<1x128xf32, #tpu.memory_space<vmem>>, %arg5: memref<8x128xf32, #tpu.memory_space<vmem>>) attributes {dimension_semantics = [], scalar_prefetch = 0 : i64, scratch_operands = 0 : i64, tpu.core_type = #tpu.core_type<tc>} {
    %c0 = arith.constant 0 : index
    %c0_0 = arith.constant 0 : index
    %0 = vector.load %arg0[%c0, %c0_0] : memref<8x768xbf16, #tpu.memory_space<vmem>>, vector<8x768xbf16>
    %c0_1 = arith.constant 0 : index
    %c0_2 = arith.constant 0 : index
    %1 = vector.load %arg1[%c0_1, %c0_2] : memref<768x128xbf16, #tpu.memory_space<vmem>>, vector<768x128xbf16>
    %cst = arith.constant dense<0.000000e+00> : vector<8x128xf32>
    %2 = tpu.matmul %0, %1, %cst {dimension_numbers = #tpu.dot_dimension_numbers<[1], [0], [0], [1], [0, 0, 1, 1], [], []>} : vector<8x768xbf16>, vector<768x128xbf16>, vector<8x128xf32> -> vector<8x128xf32>
    %c0_3 = arith.constant 0 : index
    %c0_4 = arith.constant 0 : index
    %3 = vector.load %arg2[%c0_3, %c0_4] : memref<1x128xf32, #tpu.memory_space<vmem>>, vector<1x128xf32>
    %4 = vector.broadcast %3 : vector<1x128xf32> to vector<8x128xf32>
    %5 = arith.addf %2, %4 : vector<8x128xf32>
    %cst_5 = arith.constant 0.000000e+00 : f32
    %6 = vector.broadcast %cst_5 : f32 to vector<8x128xf32>
    %7 = arith.maximumf %5, %6 : vector<8x128xf32>
    %8 = arith.truncf %7 : vector<8x128xf32> to vector<8x128xbf16>
    %c0_6 = arith.constant 0 : index
    %c0_7 = arith.constant 0 : index
    %9 = vector.load %arg3[%c0_6, %c0_7] : memref<128x128xbf16, #tpu.memory_space<vmem>>, vector<128x128xbf16>
    %cst_8 = arith.constant dense<0.000000e+00> : vector<8x128xf32>
    %10 = tpu.matmul %8, %9, %cst_8 {dimension_numbers = #tpu.dot_dimension_numbers<[1], [0], [0], [1], [0, 0, 1, 1], [], []>} : vector<8x128xbf16>, vector<128x128xbf16>, vector<8x128xf32> -> vector<8x128xf32>
    %c0_9 = arith.constant 0 : index
    %c0_10 = arith.constant 0 : index
    %11 = vector.load %arg4[%c0_9, %c0_10] : memref<1x128xf32, #tpu.memory_space<vmem>>, vector<1x128xf32>
    %12 = vector.broadcast %11 : vector<1x128xf32> to vector<8x128xf32>
    %13 = arith.addf %10, %12 : vector<8x128xf32>
    %c0_11 = arith.constant 0 : index
    %c0_12 = arith.constant 0 : index
    %14 = vector.load %arg5[%c0_11, %c0_12] : memref<8x128xf32, #tpu.memory_space<vmem>>, vector<8x128xf32>
    tpu.vector_store %arg5[%c0_11, %c0_12], %13 {strides = array<i32>} : memref<8x128xf32, #tpu.memory_space<vmem>>, vector<8x128xf32>,
    return
  }
}

</mosaic_0001>

<bundles_post_ra>
// kernel: regression_head.1
= control target key start
LH: loop header
LB: loop body
LE: loop exit
PB: predicated region body
PF: predicated region fallthrough
CT: control target
= control target key end

     0   :  { %10 = vsyncpa [#allocation3], 0  ;;  %s939_s18 = smov [#allocation2]   ;;  %s1028_s0 = inlined_call_operand.vmem [shape: bf16[8,768], index: 0, kind: input, shape index: {}]   ;;  %s1029_s1 = inlined_call_operand.hbm [shape: bf16[768,128], index: 1, kind: input, shape index: {}]   ;;  %s1030_s2 = inlined_call_operand.vmem [shape: f32[1,128], index: 2, kind: input, shape index: {}]   ;;  %s1031_s3 = inlined_call_operand.vmem [shape: bf16[128,128], index: 3, kind: input, shape index: {}]   ;;  %s1032_s4 = inlined_call_operand.vmem [shape: f32[1,128], index: 4, kind: input, shape index: {}]   ;;  %s1033_s5 = inlined_call_operand.vmem [shape: f32[8,128], index: 5, kind: output, shape index: {}]  }
   0x1   :  { %s18_s19 = sshll.u32 %s939_s18, 4  ;;  %s915_s22 = scalar_lea.hbm %s1029_s1, 6144  ;;  %s19_s19 = int_to_ptr.vmem [resolvable:$true] %s18_s19 }
   0x2   :  { %p916_p0 = scmp.ne.s32.totalorder %s1029_s1, %s915_s22  ;;  %p919_p1 = scmp.lt.u32.totalorder %s915_s22, %s1029_s1 }
   0x4   :  { %p921_p2 = pnand %p919_p1, %p916_p0 }
   0x6   :  { %924 = shalt.err (!%p921_p2)
}
   0x7   :  { %s925_s27 = scalar_lea.vmem %s19_s19, 6144  ;;  %p930_p4 = scmp.lt.s32.totalorder %s19_s19, %s19_s19 }
   0x8   :  { %p926_p3 = scmp.ne.s32.totalorder %s19_s19, %s925_s27  ;;  %p931_p5 = scmp.lt.s32.totalorder %s925_s27, %s925_s27 }
   0xa   :  { %p932_p6 = por %p931_p5, %p930_p4 }
   0xc   :  { %p933_p7 = pnand %p932_p6, %p926_p3 }
   0xe   :  { %936 = shalt.err (!%p933_p7)
}
   0xf   :  { %s940_s28 = smov 64   ;;  %s941_s29 = smov 4  }
  0x10   :  { %24 = dma.hbm_to_vmem [thread:$0]  %s1029_s1, 6144, %s19_s19, [#allocation3], %s940_s28, %s940_s28, %s941_s29  }
  0x11   :  { %937 = dma.done.wait [#allocation3], 6144  }
  0x12   :  { %938 = vsyncadd [#allocation3], 4294961152  ;;  %v853_v0 = vld [vmem:[#allocation2 + $0x40] sm:$0xff]   ;;  %v857_v4 = vld [vmem:[#allocation2 + $0x48] sm:$0xff]   ;;  %v942_v58 = vmov 0.0   ;;  %vm943_vm0 = vmmov 0  }
  0x13   :  { %v854_v1 = vld [vmem:[#allocation2] sm:$0xff]   ;;  %753 = vmatprep.subr.bf16.mxu0 %v853_v0  ;;  %v858_v5 = vld [vmem:[#allocation2 + $0x8] sm:$0xff]   ;;  %v861_v8 = vld [vmem:[#allocation2 + $0x50] sm:$0xff]  }
  0x14   :  { %v855_v2 = vld [vmem:[#allocation2 + $0xc0] sm:$0xff]   ;;  %754 = vmatpush3.bf16.msra.mxu0 %v854_v1  ;;  %v859_v6 = vld [vmem:[#allocation2 + $0xc8] sm:$0xff]   ;;  %v862_v9 = vld [vmem:[#allocation2 + $0x10] sm:$0xff]  }
  0x15   :  { %v856_v3 = vld [vmem:[#allocation2 + $0x80] sm:$0xff]   ;;  %775 = vmatprep.subr.bf16.mxu1 %v855_v2  ;;  %755 = vmatprep.subr.bf16.mxu0 %v857_v4  ;;  %v860_v7 = vld [vmem:[#allocation2 + $0x88] sm:$0xff]   ;;  %v863_v10 = vld [vmem:[#allocation2 + $0xd0] sm:$0xff]  }
  0x16   :  { %776 = vmatpush3.bf16.msra.mxu1 %v856_v3  ;;  %v864_v11 = vld [vmem:[#allocation2 + $0x90] sm:$0xff]   ;;  %v865_v12 = vld [vmem:[#allocation2 + $0x58] sm:$0xff]   ;;  %v869_v16 = vld [vmem:[#allocation2 + $0x60] sm:$0xff]  }
  0x17   :  { %777 = vmatprep.subr.bf16.mxu1 %v859_v6  ;;  %v866_v13 = vld [vmem:[#allocation2 + $0x18] sm:$0xff]   ;;  %v870_v17 = vld [vmem:[#allocation2 + $0x20] sm:$0xff]   ;;  %v873_v20 = vld [vmem:[#allocation2 + $0x68] sm:$0xff]  }
  0x18   :  { %756 = vmatpush3.bf16.msra.mxu0 %v858_v5  ;;  %v867_v14 = vld [vmem:[#allocation2 + $0xd8] sm:$0xff]   ;;  %v871_v18 = vld [vmem:[#allocation2 + $0xe0] sm:$0xff]   ;;  %v874_v21 = vld [vmem:[#allocation2 + $0x28] sm:$0xff]  }
  0x19   :  { %757 = vmatprep.subr.bf16.mxu0 %v861_v8  ;;  %v868_v15 = vld [vmem:[#allocation2 + $0x98] sm:$0xff]   ;;  %v872_v19 = vld [vmem:[#allocation2 + $0xa0] sm:$0xff]   ;;  %v875_v22 = vld [vmem:[#allocation2 + $0xe8] sm:$0xff]  }
  0x1a   :  { %778 = vmatpush3.bf16.msra.mxu1 %v860_v7  ;;  %v876_v23 = vld [vmem:[#allocation2 + $0xa8] sm:$0xff]   ;;  %v877_v24 = vld [vmem:[#allocation2 + $0x70] sm:$0xff]   ;;  %v881_v28 = vld [vmem:[#allocation2 + $0x78] sm:$0xff]  }
  0x1b   :  { %779 = vmatprep.subr.bf16.mxu1 %v863_v10  ;;  %v878_v25 = vld [vmem:[#allocation2 + $0x30] sm:$0xff]   ;;  %v882_v29 = vld [vmem:[#allocation2 + $0x38] sm:$0xff]   ;;  %v35_v31 = vld [vmem:[%s1028_s0] sm:$0xff] }
  0x1c   :  { %758 = vmatpush3.bf16.msra.mxu0 %v862_v9  ;;  %v879_v26 = vld [vmem:[#allocation2 + $0xf0] sm:$0xff]   ;;  %v883_v30 = vld [vmem:[#allocation2 + $0xf8] sm:$0xff]   ;;  %v690_v32 = vcombine.low %v35_v31, %v35_v31  ;;  %v691_v33 = vcombine.high %v35_v31, %v35_v31  ;;  %v887_v35 = vld [vmem:[#allocation2 + $0x140] sm:$0xff]  }
  0x1d   :  { %759 = vmatprep.subr.bf16.mxu0 %v865_v12  ;;  %v880_v27 = vld [vmem:[#allocation2 + $0xb0] sm:$0xff]   ;;  %v886_v34 = vld [vmem:[#allocation2 + $0xb8] sm:$0xff]   ;;  %v36_v36 = vld [vmem:[%s1028_s0 + $0x8] sm:$0xff] }
  0x1e   :  { %780 = vmatpush3.bf16.msra.mxu1 %v864_v11  ;;  %482 = vmatprep.mubr.bf16.mxu0 %v691_v33  ;;  %v692_v37 = vcombine.low %v36_v36, %v36_v36  ;;  %v693_v38 = vcombine.high %v36_v36, %v36_v36  ;;  %v890_v39 = vld [vmem:[#allocation2 + $0x100] sm:$0xff]   ;;  %v891_v40 = vld [vmem:[#allocation2 + $0x148] sm:$0xff]   ;;  %v893_v42 = vld [vmem:[#allocation2 + $0x150] sm:$0xff]  }
  0x1f   :  { %781 = vmatprep.subr.bf16.mxu1 %v867_v14  ;;  %v892_v41 = vld [vmem:[#allocation2 + $0x108] sm:$0xff]   ;;  %v894_v43 = vld [vmem:[#allocation2 + $0x110] sm:$0xff]   ;;  %v895_v44 = vld [vmem:[#allocation2 + $0x158] sm:$0xff]  }
  0x20   :  { %760 = vmatpush3.bf16.msra.mxu0 %v866_v13  ;;  %522 = vmatprep.mubr.bf16.mxu1 %v693_v38  ;;  %v896_v45 = vld [vmem:[#allocation2 + $0x118] sm:$0xff]   ;;  %v897_v46 = vld [vmem:[#allocation2 + $0x160] sm:$0xff]   ;;  %v899_v48 = vld [vmem:[#allocation2 + $0x168] sm:$0xff]  }
  0x21   :  { %761 = vmatprep.subr.bf16.mxu0 %v869_v16  ;;  %v898_v47 = vld [vmem:[#allocation2 + $0x120] sm:$0xff]   ;;  %v37_v49 = vld [vmem:[%s1028_s0 + $0x10] sm:$0xff]  ;;  %v900_v51 = vld [vmem:[#allocation2 + $0x128] sm:$0xff]  }
  0x22   :  { %782 = vmatpush3.bf16.msra.mxu1 %v868_v15  ;;  %v695_v50 = vcombine.high %v37_v49, %v37_v49  ;;  %v901_v52 = vld [vmem:[#allocation2 + $0x170] sm:$0xff]   ;;  %v903_v54 = vld [vmem:[#allocation2 + $0x178] sm:$0xff]   ;;  %v694_v56 = vcombine.low %v37_v49, %v37_v49  ;;  %v907_v57 = vld [vmem:[%s1031_s3] sm:$0xff]  }
  0x23   :  { %783 = vmatprep.subr.bf16.mxu1 %v871_v18  ;;  %v902_v53 = vld [vmem:[#allocation2 + $0x130] sm:$0xff]   ;;  %v904_v55 = vld [vmem:[#allocation2 + $0x138] sm:$0xff]   ;;  %v908_v59 = vld [vmem:[%s1031_s3 + $0x8] sm:$0xff]  }
  0x24   :  { %762 = vmatpush3.bf16.msra.mxu0 %v870_v17  ;;  %v909_v60 = vld [vmem:[%s1031_s3 + $0x10] sm:$0xff]   ;;  %v910_v61 = vld [vmem:[%s1031_s3 + $0x18] sm:$0xff]   ;;  %v911_v62 = vld [vmem:[%s1031_s3 + $0x20] sm:$0xff]  }
  0x25   :  { %763 = vmatprep.subr.bf16.mxu0 %v873_v20  ;;  %v912_v63 = vld [vmem:[%s1031_s3 + $0x28] sm:$0xff]   ;;  %v913_v0 = vld [vmem:[%s1031_s3 + $0x30] sm:$0xff]   ;;  %v914_v1 = vld [vmem:[%s1031_s3 + $0x38] sm:$0xff]  }
  0x26   :  { %784 = vmatpush3.bf16.msra.mxu1 %v872_v19  ;;  %v689_v3 = vld [vmem:[%s1030_s2] ss:$0 sm:$0xff] }
  0x27   :  { %785 = vmatprep.subr.bf16.mxu1 %v875_v22 }
  0x28   :  { %764 = vmatpush3.bf16.msra.mxu0 %v874_v21 }
  0x29   :  { %765 = vmatprep.subr.bf16.mxu0 %v877_v24 }
  0x2a   :  { %786 = vmatpush3.bf16.msra.mxu1 %v876_v23  ;;  %v744_v23 = vld [vmem:[%s1032_s4] ss:$0 sm:$0xff] }
  0x2b   :  { %787 = vmatprep.subr.bf16.mxu1 %v879_v26 }
  0x2c   :  { %766 = vmatpush3.bf16.msra.mxu0 %v878_v25 }
  0x2d   :  { %767 = vmatprep.subr.bf16.mxu0 %v881_v28 }
  0x2e   :  { %788 = vmatpush3.bf16.msra.mxu1 %v880_v27 }
  0x2f   :  { %789 = vmatprep.subr.bf16.mxu1 %v883_v30 }
  0x30   :  { %768 = vmatpush3.bf16.msra.mxu0 %v882_v29 }
  0x31   :  { %797 = vmatprep.subr.bf16.mxu0 %v887_v35 }
  0x32   :  { %790 = vmatpush3.bf16.msra.mxu1 %v886_v34 }
  0x33   :  { %483 = vmatmul.mubr.bf16.vlgmr.msra.gmra.mrb[0].mxu0 %v690_v32  ;;  %828 = vmatprep.subr.bf16.mxu1 %v942_v58 }
  0x34   :  { %798 = vmatpush3.bf16.msra.mxu0 %v890_v39  ;;  %562 = vmatprep.mubr.bf16.mxu0 %v695_v50 }
  0x35   :  { %523 = vmatmul.mubr.bf16.vlgmr.msra.gmra.mrb[0].mxu1 %v692_v37  ;;  %799 = vmatprep.subr.bf16.mxu0 %v891_v40 }
  0x36   :  { %829 = vmatpush3.bf16.msra.mxu1 %v907_v57  ;;  %844 = vmatprep.mubr.msk.bf16.mxu1 %vm943_vm0, %v942_v58 }
  0x37   :  { %830 = vmatprep.subr.bf16.mxu1 %v942_v58 }
  0x38   :  { %800 = vmatpush3.bf16.msra.mxu0 %v892_v41 }
  0x39   :  { %801 = vmatprep.subr.bf16.mxu0 %v893_v42 }
  0x3a   :  { %831 = vmatpush3.bf16.msra.mxu1 %v908_v59 }
  0x3b   :  { %832 = vmatprep.subr.bf16.mxu1 %v942_v58 }
  0x3c   :  { %802 = vmatpush3.bf16.msra.mxu0 %v894_v43 }
  0x3d   :  { %803 = vmatprep.subr.bf16.mxu0 %v895_v44 }
  0x3e   :  { %833 = vmatpush3.bf16.msra.mxu1 %v909_v60 }
  0x3f   :  { %834 = vmatprep.subr.bf16.mxu1 %v942_v58 }
  0x40   :  { %804 = vmatpush3.bf16.msra.mxu0 %v896_v45 }
  0x41   :  { %805 = vmatprep.subr.bf16.mxu0 %v897_v46 }
  0x42   :  { %835 = vmatpush3.bf16.msra.mxu1 %v910_v61 }
  0x43   :  { %836 = vmatprep.subr.bf16.mxu1 %v942_v58 }
  0x44   :  { %806 = vmatpush3.bf16.msra.mxu0 %v898_v47 }
  0x45   :  { %807 = vmatprep.subr.bf16.mxu0 %v899_v48 }
  0x46   :  { %837 = vmatpush3.bf16.msra.mxu1 %v911_v62 }
  0x47   :  { %838 = vmatprep.subr.bf16.mxu1 %v942_v58 }
  0x48   :  { %808 = vmatpush3.bf16.msra.mxu0 %v900_v51 }
  0x49   :  { %809 = vmatprep.subr.bf16.mxu0 %v901_v52 }
  0x4a   :  { %839 = vmatpush3.bf16.msra.mxu1 %v912_v63 }
  0x4b   :  { %840 = vmatprep.subr.bf16.mxu1 %v942_v58 }
  0x4c   :  { %810 = vmatpush3.bf16.msra.mxu0 %v902_v53 }
  0x4d   :  { %811 = vmatprep.subr.bf16.mxu0 %v903_v54 }
  0x4e   :  { %841 = vmatpush3.bf16.msra.mxu1 %v913_v0 }
  0x4f   :  { %842 = vmatprep.subr.bf16.mxu1 %v942_v58 }
  0x50   :  { %812 = vmatpush3.bf16.msra.mxu0 %v904_v55 }
  0x52   :  { %843 = vmatpush3.bf16.msra.mxu1 %v914_v1 }
  0x53   :  { %563 = vmatmul.mubr.bf16.vlgmr.msra.gmra.mrb[4].mxu0 %v694_v56 }
 0x106   :  { %v769_v2 = vpop.f32.mrb[0].mxu0 }
 0x107   :  { %v770_v4 = vpop.f32.mrb[1].mxu0 }
 0x108   :  { %v771_v5 = vadd.f32 %v770_v4, %v769_v2  ;;  %v772_v6 = vpop.f32.mrb[2].mxu0  ;;  %v791_v7 = vpop.f32.mrb[0].mxu1 }
 0x109   :  { %v773_v8 = vpop.f32.mrb[3].mxu0  ;;  %v792_v9 = vpop.f32.mrb[1].mxu1 }
 0x10a   :  { %v485_v10 = vadd.f32 %v771_v5, %v689_v3  ;;  %v793_v11 = vadd.f32 %v792_v9, %v791_v7  ;;  %v794_v12 = vpop.f32.mrb[2].mxu1 }
 0x10b   :  { %v795_v13 = vpop.f32.mrb[3].mxu1 }
 0x10c   :  { %v525_v14 = vadd.f32 %v793_v11, %v485_v10 }
 0x126   :  { %v813_v15 = vpop.f32.mrb[4].mxu0 }
 0x127   :  { %v814_v16 = vpop.f32.mrb[5].mxu0 }
 0x128   :  { %v815_v17 = vadd.f32 %v814_v16, %v813_v15  ;;  %v816_v18 = vpop.f32.mrb[6].mxu0 }
 0x129   :  { %v817_v19 = vpop.f32.mrb[7].mxu0 }
 0x12a   :  { %v565_v20 = vadd.f32 %v815_v17, %v525_v14 }
 0x12c   :  { %v570_v21 = vmax.f32 %v565_v20, 0.0 }
 0x12e   :  { %v571_v22 = vpack.c.bf16 %v570_v21, %v570_v21 }
 0x130   :  { %845 = vmatmul.mubr.bf16.vlgmr.msra.gmra.mrb[4].mxu1 %v571_v22 }
 0x203   :  { %v677_v24 = vpop.f32.mrb[4].mxu1 }
 0x204   :  { %v678_v25 = vadd.f32 %v744_v23, %v677_v24  ;;  %v846_v26 = vpop.f32.mrb[5].mxu1 }
 0x205   :  { %v680_v27 = vpop.f32.mrb[6].mxu1 }
 0x206   :  { %683 = vst [vmem:[%s1033_s5] sm:$0xff] %v678_v25  ;;  %v847_v28 = vpop.f32.mrb[7].mxu1 }
 0x207   :  { %688 = vsyncpa [#allocation3], 1 }

</bundles_post_ra>
